<compile_context>
chip_gen: v7x
topology: tpu7x:2x2x1
jax: 0.10.0
libtpu: 0.0.40
codegen_flags: <defaults>
</compile_context>

<pallas_src>
import functools

import jax
import jax.numpy as jnp
from jax.experimental import pallas as pl
from jax.experimental.pallas import tpu as pltpu

_LANE = 128          # TPU lane width: pad K and N to this for dense loads/stores.
_TILE_B = 256        # batch tile for the gridded path (fits v7x 64 MiB VMEM easily).
_GRIDLESS_MAX_B = 512  # below this, whole problem lives in one VMEM tile.


def _round_up(x, m):
    return ((x + m - 1) // m) * m


def _linear_kernel(x_ref, w_ref, b_ref, o_ref):
    # x_ref: (B_tile, K)  VMEM   (K = 128, zero-padded contraction dim)
    # w_ref: (K, N)       VMEM   (pre-packed: padded + transposed, MXU-native (K, N))
    # b_ref: (1, N)       VMEM
    # o_ref: (B_tile, N)  VMEM   (lane-dense output; wrapper slices real columns)
    acc = jnp.dot(x_ref[...], w_ref[...], preferred_element_type=jnp.float32)
    o_ref[...] = (acc + b_ref[...]).astype(o_ref.dtype)


def pack_params(weight, bias):
    """One-time packing of nn.Linear params (call OUTSIDE the per-step path).

    weight: (C_out, C_in) PyTorch layout  ->  (K=pad128(C_in), N=pad128(C_out)),
            transposed so the kernel contracts x @ w directly (MXU-native).
    bias:   (C_out,)                      ->  (1, N)
    Zero padding contributes nothing to the real output columns.
    """
    c_out, c_in = weight.shape
    k = _round_up(c_in, _LANE)
    n = _round_up(c_out, _LANE)
    w_packed = jnp.zeros((k, n), weight.dtype).at[:c_in, :c_out].set(weight.T)
    b_packed = jnp.zeros((1, n), bias.dtype).at[0, :c_out].set(bias)
    return jax.device_put(w_packed), jax.device_put(b_packed)


@functools.partial(jax.jit, static_argnames=("c_out",))
def dummy_model_forward(x, w_packed, b_packed, *, c_out):
    """y = x @ weight.T + bias (nn.Linear semantics), using pre-packed params.

    x:        (B, C_in) float32
    w_packed: (K, N)    float32  from pack_params
    b_packed: (1, N)    float32  from pack_params
    """
    B, c_in = x.shape
    K, N = w_packed.shape

    cost = pl.CostEstimate(
        flops=2 * B * K * N,
        transcendentals=0,
        bytes_accessed=(B * K + K * N + N + B * N) * 4,
    )

    if B <= _GRIDLESS_MAX_B:
        # Gridless: whole problem resident in VMEM, no pipeline machinery.
        x_in = x if c_in == K else jnp.pad(x, ((0, 0), (0, K - c_in)))
        y_pad = pl.pallas_call(
            _linear_kernel,
            out_shape=jax.ShapeDtypeStruct((B, N), x.dtype),
            in_specs=[
                pl.BlockSpec(memory_space=pltpu.MemorySpace.VMEM),
                pl.BlockSpec(memory_space=pltpu.MemorySpace.VMEM),
                pl.BlockSpec(memory_space=pltpu.MemorySpace.VMEM),
            ],
            out_specs=pl.BlockSpec(memory_space=pltpu.MemorySpace.VMEM),
            cost_estimate=cost,
        )(x_in, w_packed, b_packed)
        return y_pad[:, :c_out]

    # Large batch: 1-D grid over B.  Weight/bias specs map every step to block
    # (0, 0) so they stay VMEM-resident; x/out tiles are double-buffered by the
    # auto pipeline.  "parallel" lets v7x shard the batch axis across its 2 TCs.
    b_pad = _round_up(B, _TILE_B)
    x_in = jnp.pad(x, ((0, b_pad - B), (0, K - c_in)))
    y_pad = pl.pallas_call(
        _linear_kernel,
        out_shape=jax.ShapeDtypeStruct((b_pad, N), x.dtype),
        grid=(b_pad // _TILE_B,),
        in_specs=[
            pl.BlockSpec((_TILE_B, K), lambda i: (i, 0)),
            pl.BlockSpec((K, N), lambda i: (0, 0)),
            pl.BlockSpec((1, N), lambda i: (0, 0)),
        ],
        out_specs=pl.BlockSpec((_TILE_B, N), lambda i: (i, 0)),
        compiler_params=pltpu.CompilerParams(dimension_semantics=("parallel",)),
        cost_estimate=cost,
    )(x_in, w_packed, b_packed)
    return y_pad[:B, :c_out]


if __name__ == "__main__":
    in_channels = 120
    out_channels = 2
    batch = 8

    key = jax.random.PRNGKey(0)
    kx, kw, kb, kx2 = jax.random.split(key, 4)

    # Deterministic parameter init (uniform, PyTorch-Linear-like bound 1/sqrt(fan_in))
    bound = 1.0 / (in_channels ** 0.5)
    weight = jax.random.uniform(kw, (out_channels, in_channels),
                                minval=-bound, maxval=bound, dtype=jnp.float32)
    bias = jax.random.uniform(kb, (out_channels,),
                              minval=-bound, maxval=bound, dtype=jnp.float32)
    x = jax.random.normal(kx, (batch, in_channels), dtype=jnp.float32)

    # One-time param packing (pad + transpose), outside the per-call path.
    w_packed, b_packed = pack_params(weight, bias)
    jax.block_until_ready((w_packed, b_packed))

    # Small-batch (gridless) path — the DummyModel-sized case.
    y = dummy_model_forward(x, w_packed, b_packed, c_out=out_channels)
    jax.block_until_ready(y)
    y_ref = x @ weight.T + bias
    assert y.shape == (batch, out_channels)
    assert jnp.allclose(y, y_ref, atol=1e-5, rtol=1e-5)

    # Larger-batch (gridded, parallel) path sanity check.
    x_big = jax.random.normal(kx2, (768, in_channels), dtype=jnp.float32)
    y_big = dummy_model_forward(x_big, w_packed, b_packed, c_out=out_channels)
    jax.block_until_ready(y_big)
    y_big_ref = x_big @ weight.T + bias
    assert y_big.shape == (768, out_channels)
    assert jnp.allclose(y_big, y_big_ref, atol=1e-5, rtol=1e-5)

    print("KERNEL_OK")
</pallas_src>

<mosaic_0001>
module attributes {stable_mosaic.version = 11 : i64} {
  func.func @_linear_kernel(%arg0: memref<8x128xf32, #tpu.memory_space<vmem>>, %arg1: memref<128x128xf32, #tpu.memory_space<vmem>>, %arg2: memref<1x128xf32, #tpu.memory_space<vmem>>, %arg3: memref<8x128xf32, #tpu.memory_space<vmem>>) attributes {dimension_semantics = [], scalar_prefetch = 0 : i64, scratch_operands = 0 : i64, tpu.core_type = #tpu.core_type<tc>} {
    %c0 = arith.constant 0 : index
    %c0_0 = arith.constant 0 : index
    %0 = vector.load %arg0[%c0, %c0_0] : memref<8x128xf32, #tpu.memory_space<vmem>>, vector<8x128xf32>
    %c0_1 = arith.constant 0 : index
    %c0_2 = arith.constant 0 : index
    %1 = vector.load %arg1[%c0_1, %c0_2] : memref<128x128xf32, #tpu.memory_space<vmem>>, vector<128x128xf32>
    %cst = arith.constant dense<0.000000e+00> : vector<8x128xf32>
    %2 = tpu.matmul %0, %1, %cst {dimension_numbers = #tpu.dot_dimension_numbers<[1], [0], [0], [1], [0, 0, 1, 1], [], []>} : vector<8x128xf32>, vector<128x128xf32>, vector<8x128xf32> -> vector<8x128xf32>
    %c0_3 = arith.constant 0 : index
    %c0_4 = arith.constant 0 : index
    %3 = vector.load %arg2[%c0_3, %c0_4] : memref<1x128xf32, #tpu.memory_space<vmem>>, vector<1x128xf32>
    %4 = vector.broadcast %3 : vector<1x128xf32> to vector<8x128xf32>
    %5 = arith.addf %2, %4 : vector<8x128xf32>
    %c0_5 = arith.constant 0 : index
    %c0_6 = arith.constant 0 : index
    %6 = vector.load %arg3[%c0_5, %c0_6] : memref<8x128xf32, #tpu.memory_space<vmem>>, vector<8x128xf32>
    tpu.vector_store %arg3[%c0_5, %c0_6], %5 {strides = array<i32>} : memref<8x128xf32, #tpu.memory_space<vmem>>, vector<8x128xf32>,
    return
  }
}

</mosaic_0001>

<bundles_post_ra>
// kernel: dummy_model_forward.1
= control target key start
LH: loop header
LB: loop body
LE: loop exit
PB: predicated region body
PF: predicated region fallthrough
CT: control target
= control target key end

     0   :  { %8 = vsyncpa [#allocation3], 0  ;;  %s235_s12 = smov [#allocation2]   ;;  %s282_s0 = inlined_call_operand.vmem [shape: f32[8,128], index: 0, kind: input, shape index: {}]   ;;  %s283_s1 = inlined_call_operand.hbm [shape: f32[128,128], index: 1, kind: input, shape index: {}]   ;;  %s284_s2 = inlined_call_operand.vmem [shape: f32[1,128], index: 2, kind: input, shape index: {}]   ;;  %s285_s3 = inlined_call_operand.vmem [shape: f32[8,128], index: 3, kind: output, shape index: {}]  }
   0x1   :  { %s16_s13 = sshll.u32 %s235_s12, 4  ;;  %s211_s16 = scalar_lea.hbm %s283_s1, 2048  ;;  %s17_s13 = int_to_ptr.vmem [resolvable:$true] %s16_s13 }
   0x2   :  { %p212_p0 = scmp.ne.s32.totalorder %s283_s1, %s211_s16  ;;  %p215_p1 = scmp.lt.u32.totalorder %s211_s16, %s283_s1 }
   0x4   :  { %p217_p2 = pnand %p215_p1, %p212_p0 }
   0x6   :  { %220 = shalt.err (!%p217_p2)
}
   0x7   :  { %s221_s21 = scalar_lea.vmem %s17_s13, 2048  ;;  %p226_p4 = scmp.lt.s32.totalorder %s17_s13, %s17_s13 }
   0x8   :  { %p222_p3 = scmp.ne.s32.totalorder %s17_s13, %s221_s21  ;;  %p227_p5 = scmp.lt.s32.totalorder %s221_s21, %s221_s21 }
   0xa   :  { %p228_p6 = por %p227_p5, %p226_p4 }
   0xc   :  { %p229_p7 = pnand %p228_p6, %p222_p3 }
   0xe   :  { %232 = shalt.err (!%p229_p7)
}
   0xf   :  { %s236_s22 = smov 128   ;;  %s237_s23 = smov 8  }
  0x10   :  { %22 = dma.hbm_to_vmem [thread:$0]  %s283_s1, 2048, %s17_s13, [#allocation3], %s236_s22, %s236_s22, %s237_s23  }
  0x11   :  { %233 = dma.done.wait [#allocation3], 2048  }
  0x12   :  { %234 = vsyncadd [#allocation3], 4294965248  ;;  %v238_v0 = vmov 0.0|0.0   ;;  %vm239_vm0 = vmmov 0   ;;  %v240_v1 = vmov 0.0   ;;  %v29_v2 = vld [vmem:[#allocation2] sm:$0xff] }
  0x13   :  { %181 = vmatprep.subr.bf16.mxu0 %v238_v0  ;;  %178 = vmatprep.mubr.msk.f32.mxu0 %vm239_vm0, %v240_v1  ;;  %v30_v3 = vld [vmem:[#allocation2 + $0x8] sm:$0xff]  ;;  %v31_v4 = vld [vmem:[#allocation2 + $0x10] sm:$0xff]  ;;  %v32_v6 = vld [vmem:[#allocation2 + $0x18] sm:$0xff] }
  0x14   :  { %v182_v5 = vpack.c.bf16 %v30_v3, %v29_v2  ;;  %v185_v7 = vpack.c.bf16 %v32_v6, %v31_v4  ;;  %v33_v8 = vld [vmem:[#allocation2 + $0x20] sm:$0xff]  ;;  %v34_v9 = vld [vmem:[#allocation2 + $0x28] sm:$0xff]  ;;  %v35_v11 = vld [vmem:[#allocation2 + $0x30] sm:$0xff] }
  0x15   :  { %v188_v10 = vpack.c.bf16 %v34_v9, %v33_v8  ;;  %v36_v12 = vld [vmem:[#allocation2 + $0x38] sm:$0xff]  ;;  %v37_v14 = vld [vmem:[#allocation2 + $0x40] sm:$0xff]  ;;  %v38_v15 = vld [vmem:[#allocation2 + $0x48] sm:$0xff] }
  0x16   :  { %183 = vmatpush3.bf16.msra.mxu0 %v182_v5  ;;  %v191_v13 = vpack.c.bf16 %v36_v12, %v35_v11  ;;  %v194_v16 = vpack.c.bf16 %v38_v15, %v37_v14  ;;  %v39_v17 = vld [vmem:[#allocation2 + $0x50] sm:$0xff]  ;;  %v40_v18 = vld [vmem:[#allocation2 + $0x58] sm:$0xff]  ;;  %v41_v20 = vld [vmem:[#allocation2 + $0x60] sm:$0xff] }
  0x17   :  { %184 = vmatprep.subr.bf16.mxu0 %v238_v0  ;;  %v197_v19 = vpack.c.bf16 %v40_v18, %v39_v17  ;;  %v42_v21 = vld [vmem:[#allocation2 + $0x68] sm:$0xff]  ;;  %v43_v23 = vld [vmem:[#allocation2 + $0x70] sm:$0xff]  ;;  %v44_v24 = vld [vmem:[#allocation2 + $0x78] sm:$0xff] }
  0x18   :  { %v200_v22 = vpack.c.bf16 %v42_v21, %v41_v20  ;;  %v203_v25 = vpack.c.bf16 %v44_v24, %v43_v23  ;;  %v28_v26 = vld [vmem:[%s282_s0] sm:$0xff] }
  0x19   :  { %v128_v27 = vld [vmem:[%s284_s2] ss:$0 sm:$0xff] }
  0x1a   :  { %186 = vmatpush3.bf16.msra.mxu0 %v185_v7 }
  0x1b   :  { %187 = vmatprep.subr.bf16.mxu0 %v238_v0 }
  0x1e   :  { %189 = vmatpush3.bf16.msra.mxu0 %v188_v10 }
  0x1f   :  { %190 = vmatprep.subr.bf16.mxu0 %v238_v0 }
  0x22   :  { %192 = vmatpush3.bf16.msra.mxu0 %v191_v13 }
  0x23   :  { %193 = vmatprep.subr.bf16.mxu0 %v238_v0 }
  0x26   :  { %195 = vmatpush3.bf16.msra.mxu0 %v194_v16 }
  0x27   :  { %196 = vmatprep.subr.bf16.mxu0 %v238_v0 }
  0x2a   :  { %198 = vmatpush3.bf16.msra.mxu0 %v197_v19 }
  0x2b   :  { %199 = vmatprep.subr.bf16.mxu0 %v238_v0 }
  0x2e   :  { %201 = vmatpush3.bf16.msra.mxu0 %v200_v22 }
  0x2f   :  { %202 = vmatprep.subr.bf16.mxu0 %v238_v0 }
  0x32   :  { %204 = vmatpush3.bf16.msra.mxu0 %v203_v25 }
  0x35   :  { %179 = vmatmul.mubr.f32.vlgmr.msra.gmra.mrb[0].mxu0 %v28_v26 }
 0x108   :  { %v118_v28 = vpop.f32.mrb[0].mxu0 }
 0x109   :  { %v119_v29 = vadd.f32 %v128_v27, %v118_v28  ;;  %v180_v30 = vpop.f32.mrb[1].mxu0 }
 0x10b   :  { %122 = vst [vmem:[%s285_s3] sm:$0xff] %v119_v29 }
 0x10c   :  { %127 = vsyncpa [#allocation3], 1 }

</bundles_post_ra>
